<compile_context>
chip_gen: v7x
topology: tpu7x:2x2x1
jax: 0.10.0
libtpu: 0.0.40
codegen_flags: <defaults>
</compile_context>

<pallas_src>
import functools

import jax
import jax.numpy as jnp
from jax import lax
from jax.experimental import pallas as pl
from jax.experimental.pallas import tpu as pltpu


def _round_up(x: int, m: int) -> int:
    return ((x + m - 1) // m) * m


def _vmem_budget_bytes() -> int:
    """Generation-aware VMEM budget: ~half physical capacity, capped at 64 MiB.
    v5e/v6e (128 MiB physical) -> 64 MiB; v7x (64 MiB per TC) -> 32 MiB, which
    leaves headroom for double buffers on both megacore TensorCores."""
    try:
        cap = int(pltpu.get_tpu_info().vmem_capacity_bytes)
    except Exception:
        cap = 128 * 1024 * 1024
    return min(cap // 2, 64 * 1024 * 1024)


def _pick_block_rows(batch: int, num_classes: int, stream_elem_bytes: int,
                     vmem_budget: int) -> int:
    """Rows per batch tile from a byte budget: double-buffered input streams
    plus ~8 f32 (TB, C) temporaries must fit the budget; cap to keep the
    per-step working set bounded even for tiny C."""
    bytes_per_row = num_classes * (2 * stream_elem_bytes + 8 * 4)
    tb = vmem_budget // max(bytes_per_row, 1)
    tb = max(8, (tb // 8) * 8)
    tb = min(tb, 8192)
    return min(tb, _round_up(batch, 8))


def _dbfl_kernel(pred_ref, tgt_ref, pc_ref, pi_ref, out_ref, *,
                 gamma, inv_lambda, eps, batch, block_rows, mask_tail):
    # Upcast in-VMEM; inputs arrive in their native dtype.
    logits = pred_ref[...].astype(jnp.float32)     # (TB, C)
    tgt = tgt_ref[...].astype(jnp.float32)         # (TB, C)
    p_c = pc_ref[...].astype(jnp.float32)          # (TB, C) or (1, C)
    p_i = pi_ref[...].astype(jnp.float32)          # (TB, C) or (1, C)

    # r = clamp(P_C / P_I, eps, 1)   (approx recip: feeds only mul/clamp)
    r = jnp.clip(p_c * pl.reciprocal(p_i, approx=True), eps, 1.0)

    # Row softmax: q = e / sum(e), e = exp(logits - mean)
    row_mean = jnp.mean(logits, axis=1, keepdims=True)          # (TB, 1)
    e = jnp.exp(logits - row_mean)                               # (TB, C)
    denom = jnp.sum(e, axis=1, keepdims=True)                    # (TB, 1)
    q = e * (1.0 / denom)                # exact recip on (TB,1); q feeds a log

    # 1 - sigmoid(logits) = 1 / (1 + exp(logits)) = 1 / (1 + e * exp(row_mean))
    # Reuses the softmax exp; exp(row_mean) is only (TB, 1).
    one_m_sig = pl.reciprocal(1.0 + e * jnp.exp(row_mean), approx=True)

    g = float(gamma)
    if g == 0.0:
        focal = jnp.ones_like(one_m_sig)
    elif g == float(int(g)) and 1.0 <= g <= 4.0:
        focal = one_m_sig
        for _ in range(int(g) - 1):
            focal = focal * one_m_sig
    else:
        focal = one_m_sig ** g

    # log((t+eps)/(q+eps)) as a difference of logs (no full-tile divide).
    log_term = jnp.log(tgt + eps) - jnp.log(q + eps)
    weight = (1.0 + inv_lambda) - (1.0 - inv_lambda) * tgt

    loss = (r * focal) * (weight * log_term)                     # (TB, C)

    if mask_tail:
        # Last (partial) tile: zero rows past the true batch size.  The block
        # origin is i*block_rows (Pallas pads, not clamps, boundary blocks).
        i = pl.program_id(0)
        row = i * block_rows + lax.broadcasted_iota(jnp.int32, (block_rows, 1), 0)
        loss = jnp.where(row < batch, loss, 0.0)

    # Lane-dense (8, C) partial: sublane-group sums (pure vreg-wise adds),
    # no full cross-lane reduction to a scalar.
    out_ref[...] = jnp.sum(
        loss.reshape(block_rows // 8, 8, loss.shape[-1]), axis=0)


def distribution_balanced_focal_loss(predictions, target, P_C, P_I, *,
                                     gamma=2.0, lambda_val=0.5,
                                     smooth_eps=1e-8, block_rows=None):
    """Scalar distribution-balanced focal loss.

    predictions / target: (B, C).  P_C / P_I: (B, C) per the PyTorch spec, or
    (C,) / (1, C) per-class statistics (broadcast across the batch), which
    halves the HBM traffic of this memory-bound kernel.
    """
    B, C = predictions.shape
    assert target.shape == (B, C)

    def _norm_stat(x):
        return x.reshape(1, -1) if x.ndim == 1 else x

    P_C = _norm_stat(P_C)
    P_I = _norm_stat(P_I)
    assert P_C.shape in ((B, C), (1, C)) and P_I.shape == P_C.shape
    per_class_stats = (P_C.shape[0] == 1)

    # Dtype-aware byte accounting of the batch-tiled input streams.
    stream_elem_bytes = predictions.dtype.itemsize + target.dtype.itemsize
    if not per_class_stats:
        stream_elem_bytes += P_C.dtype.itemsize + P_I.dtype.itemsize

    vmem_budget = _vmem_budget_bytes()
    tb = (_pick_block_rows(B, C, stream_elem_bytes, vmem_budget)
          if block_rows is None else int(block_rows))
    num_tiles = pl.cdiv(B, tb)
    mask_tail = (B % tb) != 0

    kernel = functools.partial(
        _dbfl_kernel,
        gamma=float(gamma),
        inv_lambda=1.0 / float(lambda_val),
        eps=float(smooth_eps),
        batch=B,
        block_rows=tb,
        mask_tail=mask_tail,
    )

    tiled_spec = pl.BlockSpec((tb, C), lambda i: (i, 0))
    if per_class_stats:
        # Resident (1, C) block: fetched once, no per-step HBM traffic.
        stat_spec = pl.BlockSpec((1, C), lambda i: (0, 0))
    else:
        stat_spec = pl.BlockSpec((tb, C), lambda i: (i, 0))

    partials = pl.pallas_call(
        kernel,
        out_shape=jax.ShapeDtypeStruct((num_tiles * 8, C), jnp.float32),
        grid_spec=pltpu.PrefetchScalarGridSpec(
            num_scalar_prefetch=0,
            grid=(num_tiles,),
            in_specs=[tiled_spec, tiled_spec, stat_spec, stat_spec],
            out_specs=pl.BlockSpec((8, C), lambda i: (i, 0)),
        ),
        compiler_params=pltpu.CompilerParams(
            dimension_semantics=("parallel",),
            vmem_limit_bytes=vmem_budget,
        ),
    )(predictions, target, P_C, P_I)

    # Final reduction over tiny per-tile partials in the wrapper so the batch
    # grid axis stays "parallel".
    return jnp.sum(partials)


def _dbfl_ref(predictions, target, P_C, P_I, *,
              gamma=2.0, lambda_val=0.5, smooth_eps=1e-8):
    """Pure-JAX reference mirroring the PyTorch forward."""
    r = jnp.clip(P_C / P_I, smooth_eps, 1.0)
    q = jnp.exp(predictions - jnp.mean(predictions, axis=1, keepdims=True))
    q = q / jnp.sum(q, axis=1, keepdims=True)
    focal = (1.0 - jax.nn.sigmoid(predictions)) ** gamma
    log_term = jnp.log((target + smooth_eps) / (q + smooth_eps))
    inv_lam = 1.0 / lambda_val
    weight = 1.0 - (1.0 - inv_lam) * target + inv_lam
    return jnp.sum(r * focal * weight * log_term)


if __name__ == "__main__":
    key = jax.random.PRNGKey(0)
    k1, k2, k3, k4, k5, k6, k7, k8 = jax.random.split(key, 8)

    # Test 1: PyTorch-spec shapes, all four inputs (B, C).
    B, C = 8, 32
    predictions = jax.random.normal(k1, (B, C), dtype=jnp.float32)
    target = (jax.random.uniform(k2, (B, C)) < 0.3).astype(jnp.float32)
    P_C = jax.random.uniform(k3, (B, C), dtype=jnp.float32, minval=0.05, maxval=1.0)
    P_I = jax.random.uniform(k4, (B, C), dtype=jnp.float32, minval=0.05, maxval=1.0)

    loss = distribution_balanced_focal_loss(predictions, target, P_C, P_I)
    jax.block_until_ready(loss)
    ref = _dbfl_ref(predictions, target, P_C, P_I)
    # Tolerance leaves headroom for the EUP approx reciprocals.
    assert jnp.allclose(loss, ref, rtol=5e-3, atol=1e-2), (loss, ref)

    # Test 2: per-class statistics (broadcast path), multi-tile + tail masking.
    B2, C2 = 20, 32
    pred2 = jax.random.normal(k5, (B2, C2), dtype=jnp.float32)
    tgt2 = (jax.random.uniform(k6, (B2, C2)) < 0.3).astype(jnp.float32)
    pc2 = jax.random.uniform(k7, (C2,), dtype=jnp.float32, minval=0.05, maxval=1.0)
    pi2 = jax.random.uniform(k8, (C2,), dtype=jnp.float32, minval=0.05, maxval=1.0)

    loss2 = distribution_balanced_focal_loss(pred2, tgt2, pc2, pi2, block_rows=8)
    jax.block_until_ready(loss2)
    ref2 = _dbfl_ref(pred2, tgt2, pc2.reshape(1, C2), pi2.reshape(1, C2))
    assert jnp.allclose(loss2, ref2, rtol=5e-3, atol=1e-2), (loss2, ref2)

    print("KERNEL_OK")
</pallas_src>

<mosaic_0001>
module attributes {stable_mosaic.version = 11 : i64} {
  func.func @_dbfl_kernel(%arg0: i32, %arg1: memref<8x32xf32, #tpu.memory_space<vmem>>, %arg2: memref<8x32xf32, #tpu.memory_space<vmem>>, %arg3: memref<8x32xf32, #tpu.memory_space<vmem>>, %arg4: memref<8x32xf32, #tpu.memory_space<vmem>>, %arg5: memref<8x32xf32, #tpu.memory_space<vmem>>) attributes {dimension_semantics = [#tpu.dimension_semantics<parallel>], iteration_bounds = array<i64: 1>, scalar_prefetch = 0 : i64, scratch_operands = 0 : i64, tpu.core_type = #tpu.core_type<tc>, window_params = [{transform_indices = @transform_0, window_bounds = array<i64: 8, 32>}, {transform_indices = @transform_1, window_bounds = array<i64: 8, 32>}, {transform_indices = @transform_2, window_bounds = array<i64: 8, 32>}, {transform_indices = @transform_3, window_bounds = array<i64: 8, 32>}, {transform_indices = @transform_4, window_bounds = array<i64: 8, 32>}]} {
    %c0 = arith.constant 0 : index
    %c0_0 = arith.constant 0 : index
    %0 = vector.load %arg1[%c0, %c0_0] : memref<8x32xf32, #tpu.memory_space<vmem>>, vector<8x32xf32>
    %c0_1 = arith.constant 0 : index
    %c0_2 = arith.constant 0 : index
    %1 = vector.load %arg2[%c0_1, %c0_2] : memref<8x32xf32, #tpu.memory_space<vmem>>, vector<8x32xf32>
    %c0_3 = arith.constant 0 : index
    %c0_4 = arith.constant 0 : index
    %2 = vector.load %arg3[%c0_3, %c0_4] : memref<8x32xf32, #tpu.memory_space<vmem>>, vector<8x32xf32>
    %c0_5 = arith.constant 0 : index
    %c0_6 = arith.constant 0 : index
    %3 = vector.load %arg4[%c0_5, %c0_6] : memref<8x32xf32, #tpu.memory_space<vmem>>, vector<8x32xf32>
    %4 = tpu.reciprocal %3 {approx = true} : vector<8x32xf32> -> vector<8x32xf32>
    %5 = arith.mulf %2, %4 : vector<8x32xf32>
    %cst = arith.constant 9.99999993E-9 : f32
    %cst_7 = arith.constant 1.000000e+00 : f32
    %6 = vector.broadcast %cst : f32 to vector<8x32xf32>
    %7 = arith.maximumf %6, %5 : vector<8x32xf32>
    %8 = vector.broadcast %cst_7 : f32 to vector<8x32xf32>
    %9 = arith.minimumf %8, %7 : vector<8x32xf32>
    %cst_8 = arith.constant dense<0.000000e+00> : vector<8xf32>
    %10 = vector.multi_reduction <add>, %0, %cst_8 [1] : vector<8x32xf32> to vector<8xf32>
    %11 = vector.shape_cast %10 : vector<8xf32> to vector<8x1xf32>
    %cst_9 = arith.constant 3.200000e+01 : f32
    %12 = vector.broadcast %cst_9 : f32 to vector<8x1xf32>
    %13 = arith.divf %11, %12 : vector<8x1xf32>
    %14 = vector.broadcast %13 : vector<8x1xf32> to vector<8x32xf32>
    %15 = arith.subf %0, %14 : vector<8x32xf32>
    %16 = math.exp %15 : vector<8x32xf32>
    %cst_10 = arith.constant dense<0.000000e+00> : vector<8xf32>
    %17 = vector.multi_reduction <add>, %16, %cst_10 [1] : vector<8x32xf32> to vector<8xf32>
    %18 = vector.shape_cast %17 : vector<8xf32> to vector<8x1xf32>
    %cst_11 = arith.constant 1.000000e+00 : f32
    %19 = vector.broadcast %cst_11 : f32 to vector<8x1xf32>
    %20 = arith.divf %19, %18 : vector<8x1xf32>
    %21 = vector.broadcast %20 : vector<8x1xf32> to vector<8x32xf32>
    %22 = arith.mulf %16, %21 : vector<8x32xf32>
    %23 = math.exp %13 : vector<8x1xf32>
    %24 = vector.broadcast %23 : vector<8x1xf32> to vector<8x32xf32>
    %25 = arith.mulf %16, %24 : vector<8x32xf32>
    %cst_12 = arith.constant 1.000000e+00 : f32
    %26 = vector.broadcast %cst_12 : f32 to vector<8x32xf32>
    %27 = arith.addf %26, %25 : vector<8x32xf32>
    %28 = tpu.reciprocal %27 {approx = true} : vector<8x32xf32> -> vector<8x32xf32>
    %29 = arith.mulf %28, %28 : vector<8x32xf32>
    %cst_13 = arith.constant 9.99999993E-9 : f32
    %30 = vector.broadcast %cst_13 : f32 to vector<8x32xf32>
    %31 = arith.addf %1, %30 : vector<8x32xf32>
    %32 = math.log %31 : vector<8x32xf32>
    %cst_14 = arith.constant 9.99999993E-9 : f32
    %33 = vector.broadcast %cst_14 : f32 to vector<8x32xf32>
    %34 = arith.addf %22, %33 : vector<8x32xf32>
    %35 = math.log %34 : vector<8x32xf32>
    %36 = arith.subf %32, %35 : vector<8x32xf32>
    %cst_15 = arith.constant -1.000000e+00 : f32
    %37 = vector.broadcast %cst_15 : f32 to vector<8x32xf32>
    %38 = arith.mulf %37, %1 : vector<8x32xf32>
    %cst_16 = arith.constant 3.000000e+00 : f32
    %39 = vector.broadcast %cst_16 : f32 to vector<8x32xf32>
    %40 = arith.subf %39, %38 : vector<8x32xf32>
    %41 = arith.mulf %9, %29 : vector<8x32xf32>
    %42 = arith.mulf %40, %36 : vector<8x32xf32>
    %43 = arith.mulf %41, %42 : vector<8x32xf32>
    %44 = vector.shape_cast %43 : vector<8x32xf32> to vector<1x8x32xf32>
    %cst_17 = arith.constant dense<0.000000e+00> : vector<8x32xf32>
    %45 = vector.multi_reduction <add>, %44, %cst_17 [0] : vector<1x8x32xf32> to vector<8x32xf32>
    %c0_18 = arith.constant 0 : index
    %c0_19 = arith.constant 0 : index
    %46 = vector.load %arg5[%c0_18, %c0_19] : memref<8x32xf32, #tpu.memory_space<vmem>>, vector<8x32xf32>
    tpu.vector_store %arg5[%c0_18, %c0_19], %45 {strides = array<i32>} : memref<8x32xf32, #tpu.memory_space<vmem>>, vector<8x32xf32>,
    return
  }
  func.func @transform_0(%arg0: i32) -> (i32, i32) {
    %c0_i32 = arith.constant 0 : i32
    %c0_i32_0 = arith.constant 0 : i32
    return %arg0, %c0_i32 : i32, i32
  }
  func.func @transform_1(%arg0: i32) -> (i32, i32) {
    %c0_i32 = arith.constant 0 : i32
    %c0_i32_0 = arith.constant 0 : i32
    return %arg0, %c0_i32 : i32, i32
  }
  func.func @transform_2(%arg0: i32) -> (i32, i32) {
    %c0_i32 = arith.constant 0 : i32
    %c0_i32_0 = arith.constant 0 : i32
    return %arg0, %c0_i32 : i32, i32
  }
  func.func @transform_3(%arg0: i32) -> (i32, i32) {
    %c0_i32 = arith.constant 0 : i32
    %c0_i32_0 = arith.constant 0 : i32
    return %arg0, %c0_i32 : i32, i32
  }
  func.func @transform_4(%arg0: i32) -> (i32, i32) {
    %c0_i32 = arith.constant 0 : i32
    %c0_i32_0 = arith.constant 0 : i32
    return %arg0, %c0_i32 : i32, i32
  }
}

</mosaic_0001>

<bundles_post_ra>
// kernel: tpu_custom_call.1
= control target key start
LH: loop header
LB: loop body
LE: loop exit
PB: predicated region body
PF: predicated region fallthrough
CT: control target
= control target key end

     0   :  { %9 = vsyncpa [#allocation3], 0  ;;  %s355_s0 = inlined_call_operand.hbm [shape: f32[8,32], index: 0, kind: input, shape index: {}]   ;;  %s356_s1 = inlined_call_operand.hbm [shape: f32[8,32], index: 1, kind: input, shape index: {}]   ;;  %s357_s2 = inlined_call_operand.hbm [shape: f32[8,32], index: 2, kind: input, shape index: {}]   ;;  %s358_s3 = inlined_call_operand.hbm [shape: f32[8,32], index: 3, kind: input, shape index: {}]   ;;  %s359_s4 = inlined_call_operand.hbm [shape: f32[8,32], index: 4, kind: output, shape index: {}]  }
   0x1   :  { %10 = vsyncpa [#allocation6], 0 }
   0x2   :  { %11 = vsyncpa [#allocation9], 0 }
   0x3   :  { %12 = vsyncpa [#allocation4], 0  ;;  %s262_s15 = smov [#allocation5]   ;;  %s263_s17 = smov [#allocation2]  }
   0x4   :  { %s29_s16 = sshll.u32 %s262_s15, 4  ;;  %s19_s18 = sshll.u32 %s263_s17, 4  ;;  %s30_s16 = int_to_ptr.vmem [resolvable:$true] %s29_s16  ;;  %s20_s18 = int_to_ptr.vmem [resolvable:$true] %s19_s18 }
   0x5   :  { %s144_s21 = scalar_lea.hbm %s356_s1, 128 }
   0x6   :  { %p145_p0 = scmp.ne.s32.totalorder %s356_s1, %s144_s21  ;;  %p148_p1 = scmp.lt.u32.totalorder %s144_s21, %s356_s1 }
   0x8   :  { %p150_p2 = pnand %p148_p1, %p145_p0 }
   0xa   :  { %153 = shalt.err (!%p150_p2)
}
   0xb   :  { %s154_s26 = scalar_lea.vmem %s30_s16, 128  ;;  %p159_p4 = scmp.lt.s32.totalorder %s30_s16, %s30_s16 }
   0xc   :  { %p155_p3 = scmp.ne.s32.totalorder %s30_s16, %s154_s26  ;;  %p160_p5 = scmp.lt.s32.totalorder %s154_s26, %s154_s26 }
   0xe   :  { %p161_p6 = por %p160_p5, %p159_p4 }
  0x10   :  { %p162_p7 = pnand %p161_p6, %p155_p3 }
  0x12   :  { %165 = shalt.err (!%p162_p7)
}
  0x13   :  { %32 = dma.hbm_to_vmem [thread:$0]  %s356_s1, 128, %s30_s16, [#allocation6]  }
  0x14   :  { %s166_s5 = scalar_lea.hbm %s355_s0, 128 }
  0x15   :  { %p167_p8 = scmp.ne.s32.totalorder %s355_s0, %s166_s5  ;;  %p170_p9 = scmp.lt.u32.totalorder %s166_s5, %s355_s0 }
  0x17   :  { %p172_p10 = pnand %p170_p9, %p167_p8 }
  0x19   :  { %175 = shalt.err (!%p172_p10)
}
  0x1a   :  { %s176_s10 = scalar_lea.vmem %s20_s18, 128  ;;  %p181_p12 = scmp.lt.s32.totalorder %s20_s18, %s20_s18 }
  0x1b   :  { %p177_p11 = scmp.ne.s32.totalorder %s20_s18, %s176_s10  ;;  %p182_p13 = scmp.lt.s32.totalorder %s176_s10, %s176_s10 }
  0x1d   :  { %p183_p0 = por %p182_p13, %p181_p12 }
  0x1f   :  { %p184_p1 = pnand %p183_p0, %p177_p11 }
  0x21   :  { %187 = shalt.err (!%p184_p1)
}
  0x22   :  { %22 = dma.hbm_to_vmem [thread:$0]  %s355_s0, 128, %s20_s18, [#allocation3]  }
  0x23   :  { %s264_s12 = smov [#allocation7]   ;;  %s265_s14 = smov [#allocation8]  }
  0x24   :  { %s39_s13 = sshll.u32 %s264_s12, 4  ;;  %s49_s15 = sshll.u32 %s265_s14, 4  ;;  %s40_s13 = int_to_ptr.vmem [resolvable:$true] %s39_s13  ;;  %s50_s15 = int_to_ptr.vmem [resolvable:$true] %s49_s15 }
  0x25   :  { %s188_s19 = scalar_lea.hbm %s357_s2, 128 }
  0x26   :  { %p189_p2 = scmp.ne.s32.totalorder %s357_s2, %s188_s19  ;;  %p192_p3 = scmp.lt.u32.totalorder %s188_s19, %s357_s2 }
  0x28   :  { %p194_p4 = pnand %p192_p3, %p189_p2 }
  0x2a   :  { %197 = shalt.err (!%p194_p4)
}
  0x2b   :  { %s198_s0 = scalar_lea.vmem %s40_s13, 128  ;;  %p203_p6 = scmp.lt.s32.totalorder %s40_s13, %s40_s13 }
  0x2c   :  { %p199_p5 = scmp.ne.s32.totalorder %s40_s13, %s198_s0  ;;  %p204_p7 = scmp.lt.s32.totalorder %s198_s0, %s198_s0 }
  0x2e   :  { %p205_p8 = por %p204_p7, %p203_p6 }
  0x30   :  { %p206_p9 = pnand %p205_p8, %p199_p5 }
  0x32   :  { %209 = shalt.err (!%p206_p9)
}
  0x33   :  { %42 = dma.hbm_to_vmem [thread:$0]  %s357_s2, 128, %s40_s13, [#allocation6]  }
  0x34   :  { %s210_s27 = scalar_lea.hbm %s358_s3, 128 }
  0x35   :  { %p211_p10 = scmp.ne.s32.totalorder %s358_s3, %s210_s27  ;;  %p214_p11 = scmp.lt.u32.totalorder %s210_s27, %s358_s3 }
  0x37   :  { %p216_p12 = pnand %p214_p11, %p211_p10 }
  0x39   :  { %219 = shalt.err (!%p216_p12)
}
  0x3a   :  { %s220_s6 = scalar_lea.vmem %s50_s15, 128  ;;  %p225_p0 = scmp.lt.s32.totalorder %s50_s15, %s50_s15 }
  0x3b   :  { %p221_p13 = scmp.ne.s32.totalorder %s50_s15, %s220_s6  ;;  %p226_p1 = scmp.lt.s32.totalorder %s220_s6, %s220_s6 }
  0x3d   :  { %p227_p2 = por %p226_p1, %p225_p0 }
  0x3f   :  { %p228_p3 = pnand %p227_p2, %p221_p13 }
  0x41   :  { %231 = shalt.err (!%p228_p3)
}
  0x42   :  { %52 = dma.hbm_to_vmem [thread:$0]  %s358_s3, 128, %s50_s15, [#allocation9]  }
  0x43   :  { %254 = dma.done.wait [#allocation3], 128  }
  0x44   :  { %255 = vsyncadd [#allocation3], 4294967168 }
  0x45   :  { %256 = dma.done.wait [#allocation6], 256  }
  0x46   :  { %257 = vsyncadd [#allocation6], 4294967040 }
  0x47   :  { %258 = dma.done.wait [#allocation9], 128  }
  0x48   :  { %259 = vsyncadd [#allocation9], 4294967168  ;;  %vm73_vm0 = vcmask 261120   ;;  %v65_v0 = vld [vmem:[#allocation2] sm:$0xff]  ;;  %v68_v10 = vld [vmem:[#allocation8] sm:$0xff]  ;;  %s266_s3 = smov [#allocation10]  }
  0x49   :  { %v74_v1 = vsel %vm73_vm0, %v65_v0, 0.0  ;;  %v66_v12 = vld [vmem:[#allocation5] sm:$0xff]  ;;  %v67_v20 = vld [vmem:[#allocation7] sm:$0xff]  ;;  %s114_s8 = sshll.u32 %s266_s3, 4  ;;  %s115_s8 = int_to_ptr.vmem [resolvable:$true] %s114_s8 }
  0x4a   :  { %75 = vadd.xlane.f32.xlu0 %v74_v1  ;;  %v94_v14 = vadd.f32 1e-08, %v66_v12  ;;  %v101_v24 = vmul.f32 -1.0, %v66_v12  ;;  %s232_s9 = scalar_lea.vmem %s115_s8, 128  ;;  %p237_p5 = scmp.lt.s32.totalorder %s115_s8, %s115_s8 }
  0x4b   :  { %p233_p4 = scmp.ne.s32.totalorder %s115_s8, %s232_s9  ;;  %p238_p6 = scmp.lt.s32.totalorder %s232_s9, %s232_s9 }
  0x4c   :  { %v102_v31 = vsub.f32 3.0, %v101_v24 }
  0x4d   :  { %p239_p7 = por %p238_p6, %p237_p5 }
  0x4f   :  { %p240_p8 = pnand %p239_p7, %p233_p4 }
  0xd7   :  { %v76_v2 = vpop.xlane.xlu0 %75 }
  0xd8   :  { %v78_v3 = vmul.f32 0.03125, %v76_v2 }
  0xda   :  { %v79_v4 = vsub.f32 %v65_v0, %v78_v3  ;;  %v88_v8 = vmul.f32 1.442695, %v78_v3 }
  0xdc   :  { %v80_v5 = vmul.f32 1.442695, %v79_v4 }
  0xde   :  { %130 = vpow2.f32 %v80_v5 }
  0xdf   :  { %132 = vpow2.f32 %v88_v8 }
  0xe8   :  { %v131_v6 = vpop.eup %130 }
  0xe9   :  { %v82_v7 = vsel %vm73_vm0, %v131_v6, 0.0  ;;  %v133_v11 = vpop.eup %132 }
  0xea   :  { %83 = vadd.xlane.f32.xlu0 %v82_v7  ;;  %v90_v13 = vmul.f32 %v133_v11, %v131_v6 }
  0xec   :  { %v91_v15 = vadd.f32 1.0, %v90_v13 }
 0x177   :  { %v84_v9 = vpop.xlane.xlu0 %83 }
 0x178   :  { %134 = vrcp.f32 %v84_v9 }
 0x179   :  { %136 = vrcp.f32 %v68_v10 }
 0x17a   :  { %138 = vlog2.f32 %v94_v14 }
 0x17b   :  { %140 = vrcp.f32 %v91_v15 }
 0x182   :  { %v135_v16 = vpop.eup %134 }
 0x183   :  { %v87_v17 = vmul.f32 %v135_v16, %v131_v6  ;;  %v137_v19 = vpop.eup %136 }
 0x184   :  { %v70_v21 = vmul.f32 %v137_v19, %v67_v20  ;;  %v139_v22 = vpop.eup %138 }
 0x185   :  { %v97_v18 = vadd.f32 1e-08, %v87_v17  ;;  %v141_v25 = vpop.eup %140  ;;  %v96_v26 = vmul.f32 0.6931472, %v139_v22 }
 0x186   :  { %v71_v23 = vmax.f32 %v70_v21, 1e-08  ;;  %v93_v29 = vmul.f32 %v141_v25, %v141_v25 }
 0x187   :  { %142 = vlog2.f32 %v97_v18 }
 0x188   :  { %v72_v28 = vmin.f32 %v71_v23, 1.0 }
 0x18a   :  { %v103_v33 = vmul.f32 %v93_v29, %v72_v28 }
 0x191   :  { %v143_v27 = vpop.eup %142 }
 0x192   :  { %v99_v30 = vmul.f32 0.6931472, %v143_v27 }
 0x194   :  { %v100_v32 = vsub.f32 %v96_v26, %v99_v30 }
 0x196   :  { %v104_v34 = vmul.f32 %v102_v31, %v100_v32 }
 0x198   :  { %v105_v35 = vmul.f32 %v104_v34, %v103_v33 }
 0x19a   :  { %107 = vst.msk [vmem:[#allocation10] sm:$0xff] %vm73_vm0, %v105_v35 }
 0x19b   :  { %243 = shalt.err (!%p240_p8)
}
 0x19c   :  { %s244_s11 = scalar_lea.hbm %s359_s4, 128 }
 0x19d   :  { %p245_p9 = scmp.ne.s32.totalorder %s359_s4, %s244_s11  ;;  %p248_p10 = scmp.lt.u32.totalorder %s244_s11, %s359_s4 }
 0x19f   :  { %p250_p11 = pnand %p248_p10, %p245_p9 }
 0x1a1   :  { %253 = shalt.err (!%p250_p11)
}
 0x1a2   :  { %117 = dma.vmem_to_hbm [thread:$0]  %s115_s8, 128, %s359_s4, [#allocation4]  }
 0x1a3   :  { %260 = dma.done.wait [#allocation4], 128  }
 0x1a4   :  { %261 = vsyncadd [#allocation4], 4294967168 }
 0x1a5   :  { %121 = vsyncpa [#allocation3], 1 }
 0x1a6   :  { %122 = vsyncpa [#allocation6], 1 }
 0x1a7   :  { %123 = vsyncpa [#allocation9], 1 }
 0x1a8   :  { %124 = vsyncpa [#allocation4], 1 }

</bundles_post_ra>
